<compile_context>
chip_gen: v6e
topology: v6e:2x2x1
jax: 0.10.0
libtpu: 0.0.40
codegen_flags: <defaults>
</compile_context>

<pallas_src>
import jax
import jax.numpy as jnp
from jax.experimental import pallas as pl
from jax.experimental.pallas import tpu as pltpu

_LANE = 128            # padded feature width used for all intermediates
_TILE_CAP = 2048       # max batch-tile rows (~8-10 MiB working set in VMEM)
_MIN_PARALLEL_ROWS = 1024  # once batch >= this, use >=2 grid steps (v7x 2 TCs)


def _qnetwork_kernel(x_ref, w1_ref, w_stack_ref, b_stack_ref, out_ref):
    x = x_ref[...]                                   # [TB, S] f32
    b = b_stack_ref[...]                             # [8, 128] f32 bias+mask stack

    def mm(act_f32, w_bf16):
        # bf16 operands into the MXU, f32 accumulation.
        return jnp.dot(act_f32.astype(jnp.bfloat16), w_bf16,
                       preferred_element_type=jnp.float32)

    # Trunk: fc1 -> relu -> fc2 -> relu -> fc3 -> relu.
    # Weights are zero-padded to 128 lanes/rows, so every intermediate is a
    # lane-dense [TB, 128] tile and padded columns stay exactly 0.
    h = jnp.maximum(mm(x, w1_ref[...]) + b[0:1, :], 0.0)
    h = jnp.maximum(mm(h, w_stack_ref[0]) + b[1:2, :], 0.0)
    h = jnp.maximum(mm(h, w_stack_ref[1]) + b[2:3, :], 0.0)

    # Fused head hidden layer: [adv_fc1 | val_fc1] in one [128,128] matmul.
    hh = jnp.maximum(mm(h, w_stack_ref[2]) + b[3:4, :], 0.0)  # cols :64 adv, 64: val

    # Fused output heads: block-diagonal weight -> adv logits in cols [0, A),
    # scalar value in col A, zeros elsewhere.
    av = mm(hh, w_stack_ref[3]) + b[4:5, :]          # [TB, 128]

    # Dueling combine with full-128-lane masked reductions (no narrow slices):
    #   b[5] = 1/A on cols [0,A), 0 elsewhere   -> adv mean
    #   b[6] = one-hot at col A                 -> value
    adv_mean = jnp.sum(av * b[5:6, :], axis=1, keepdims=True)  # [TB, 1]
    val = jnp.sum(av * b[6:7, :], axis=1, keepdims=True)       # [TB, 1]

    # Lane-dense 128-wide unmasked store: cols [0, A) hold q = val + adv - mean;
    # padded columns hold junk and are ignored by the consumer.
    out_ref[...] = (val - adv_mean) + av


def pack_params(params, action_size):
    """Pack the 14 logical tensors into 3 lane-dense kernel operands.

    Returns (w1 [S,128] bf16, w_stack [4,128,128] bf16, b_stack [8,128] f32).
    """
    a = action_size
    assert a + 1 <= _LANE, "action_size + 1 must fit in one 128-lane tile"
    assert params["w1"].shape[1] == 64, "fc1 must have 64 outputs"
    assert params["w2"].shape == (64, 128) and params["w3"].shape == (128, 64)
    assert params["wa1"].shape == (64, 64) and params["wv1"].shape == (64, 64)
    assert params["wao"].shape == (64, a) and params["wvo"].shape == (64, 1)

    def pad_cols(w):
        return jnp.pad(w, ((0, 0), (0, _LANE - w.shape[1])))

    def pad_rows(w):
        return jnp.pad(w, ((0, _LANE - w.shape[0]), (0, 0)))

    def pad_b(v):
        v = v.reshape(-1)
        return jnp.pad(v, (0, _LANE - v.shape[0]))

    w1p = pad_cols(params["w1"]).astype(jnp.bfloat16)              # [S, 128]
    w2p = pad_rows(params["w2"])                                   # [128, 128]
    w3p = pad_cols(params["w3"])                                   # [128, 128]
    w_heads = pad_rows(
        jnp.concatenate([params["wa1"], params["wv1"]], axis=1))   # [128, 128]
    w_out = jnp.zeros((_LANE, _LANE), jnp.float32)
    w_out = w_out.at[0:64, 0:a].set(params["wao"])
    w_out = w_out.at[64:128, a:a + 1].set(params["wvo"])
    w_stack = jnp.stack([w2p, w3p, w_heads, w_out]).astype(jnp.bfloat16)

    b_heads = jnp.concatenate(
        [params["ba1"].reshape(-1), params["bv1"].reshape(-1)])
    b_out = jnp.concatenate(
        [params["bao"].reshape(-1), params["bvo"].reshape(-1)])
    adv_mask = jnp.zeros((_LANE,), jnp.float32).at[:a].set(1.0 / a)
    val_mask = jnp.zeros((_LANE,), jnp.float32).at[a].set(1.0)
    b_stack = jnp.stack([
        pad_b(params["b1"]), pad_b(params["b2"]), pad_b(params["b3"]),
        pad_b(b_heads), pad_b(b_out), adv_mask, val_mask,
        jnp.zeros((_LANE,), jnp.float32),
    ]).astype(jnp.float32)                                         # [8, 128]

    return w1p, w_stack, b_stack


def _round_up(n, m):
    return ((n + m - 1) // m) * m


def _batch_tiling(batch):
    """Pick (tile_b, padded_batch): tile_b multiple of 8, <= _TILE_CAP."""
    grid = pl.cdiv(batch, _TILE_CAP)
    if batch >= _MIN_PARALLEL_ROWS:
        grid = max(grid, 2)          # let the parallel axis span both v7x TCs
    tile = _round_up(pl.cdiv(batch, grid), 8)
    return tile, tile * grid


def qnetwork_forward(x, packed_params, action_size, *, return_padded=False):
    """x: [B, state_size] f32; packed_params from pack_params().

    return_padded=False -> [B, action_size] (original module semantics).
    return_padded=True  -> [B, 128] lane-dense; Q-values in cols [0, action_size)
                           (avoids the extra XLA copy of a post-kernel slice).
    """
    w1p, w_stack, b_stack = packed_params
    batch, state_size = x.shape
    tile_b, padded_batch = _batch_tiling(batch)
    if padded_batch != batch:
        x = jnp.pad(x, ((0, padded_batch - batch), (0, 0)))
    grid = (padded_batch // tile_b,)

    flops = 2 * padded_batch * (state_size * 64 + 64 * 128 + 128 * 64
                                + 64 * 128 + 64 * (action_size + 1))
    bytes_accessed = (4 * x.size + 2 * (w1p.size + w_stack.size)
                      + 4 * b_stack.size + 4 * padded_batch * _LANE)

    out_padded = pl.pallas_call(
        _qnetwork_kernel,
        out_shape=jax.ShapeDtypeStruct((padded_batch, _LANE), jnp.float32),
        grid=grid,
        in_specs=[
            pl.BlockSpec((tile_b, state_size), lambda i: (i, 0)),   # x tile
            pl.BlockSpec((state_size, _LANE), lambda i: (0, 0)),    # w1 resident
            pl.BlockSpec((4, _LANE, _LANE), lambda i: (0, 0, 0)),   # weight stack
            pl.BlockSpec((8, _LANE), lambda i: (0, 0)),             # bias/mask stack
        ],
        out_specs=pl.BlockSpec((tile_b, _LANE), lambda i: (i, 0)),
        compiler_params=pltpu.CompilerParams(
            dimension_semantics=("parallel",),
            vmem_limit_bytes=32 * 1024 * 1024),
        cost_estimate=pl.CostEstimate(
            flops=flops, transcendentals=0, bytes_accessed=bytes_accessed),
    )(x, w1p, w_stack, b_stack)

    if padded_batch != batch:
        out_padded = out_padded[:batch]
    if return_padded:
        return out_padded                      # [B, 128]
    return out_padded[:, :action_size]         # [B, A] (drop-in semantics)


def init_params(key, state_size, action_size):
    """Weights stored as [in, out]; biases as [1, out]. nn.Linear-style init."""
    dims = {
        "fc1": (state_size, 64),
        "fc2": (64, 128),
        "fc3": (128, 64),
        "adv_fc1": (64, 64),
        "val_fc1": (64, 64),
        "adv_out": (64, action_size),
        "val_out": (64, 1),
    }
    names = {
        "fc1": ("w1", "b1"), "fc2": ("w2", "b2"), "fc3": ("w3", "b3"),
        "adv_fc1": ("wa1", "ba1"), "val_fc1": ("wv1", "bv1"),
        "adv_out": ("wao", "bao"), "val_out": ("wvo", "bvo"),
    }
    params = {}
    for layer, (fan_in, fan_out) in dims.items():
        key, kw, kb = jax.random.split(key, 3)
        bound = 1.0 / jnp.sqrt(jnp.float32(fan_in))
        wname, bname = names[layer]
        params[wname] = jax.random.uniform(
            kw, (fan_in, fan_out), jnp.float32, minval=-bound, maxval=bound)
        params[bname] = jax.random.uniform(
            kb, (1, fan_out), jnp.float32, minval=-bound, maxval=bound)
    return params


def qnetwork_reference(x, params, matmul_dtype=jnp.float32):
    """Pure-JAX reference of the PyTorch forward.

    matmul_dtype=jnp.bfloat16 mirrors the kernel's bf16-matmul/f32-accumulate
    numerics for a tight correctness check.
    """
    def mm(a, w):
        return jnp.dot(a.astype(matmul_dtype), w.astype(matmul_dtype),
                       preferred_element_type=jnp.float32)

    h = jax.nn.relu(mm(x, params["w1"]) + params["b1"])
    h = jax.nn.relu(mm(h, params["w2"]) + params["b2"])
    h = jax.nn.relu(mm(h, params["w3"]) + params["b3"])
    adv = jax.nn.relu(mm(h, params["wa1"]) + params["ba1"])
    val = jax.nn.relu(mm(h, params["wv1"]) + params["bv1"])
    adv = mm(adv, params["wao"]) + params["bao"]
    val = mm(val, params["wvo"]) + params["bvo"]
    return val + adv - jnp.mean(adv, axis=1, keepdims=True)


if __name__ == "__main__":
    state_size = 8
    action_size = 4
    batch = 2

    key = jax.random.PRNGKey(0)
    key_x, key_p = jax.random.split(key)
    x = jax.random.normal(key_x, (batch, state_size), dtype=jnp.float32)
    params = init_params(key_p, state_size, action_size)
    packed = pack_params(params, action_size)   # pack once, reuse every call

    # Default (slice to [B, A]) path — matches the PyTorch module exactly.
    out = jax.block_until_ready(qnetwork_forward(x, packed, action_size))
    assert out.shape == (batch, action_size)

    ref_bf16 = qnetwork_reference(x, params, matmul_dtype=jnp.bfloat16)
    ref_f32 = qnetwork_reference(x, params)
    assert jnp.allclose(out, ref_bf16, atol=1e-4, rtol=1e-4), \
        "mismatch vs bf16-matmul reference"
    assert jnp.allclose(out, ref_f32, atol=1e-1, rtol=1e-1), \
        "mismatch vs f32 reference (beyond bf16 tolerance)"

    # Padded fast path (no post-kernel slice); Q-values live in cols [0, A).
    out_p = jax.block_until_ready(
        qnetwork_forward(x, packed, action_size, return_padded=True))
    assert out_p.shape == (batch, _LANE)
    assert jnp.allclose(out_p[:, :action_size], out, atol=1e-6)

    # Ragged batch (not a multiple of 8) exercises the wrapper-side padding.
    x2 = jax.random.normal(key_x, (10, state_size), dtype=jnp.float32)
    out2 = jax.block_until_ready(qnetwork_forward(x2, packed, action_size))
    ref2 = qnetwork_reference(x2, params, matmul_dtype=jnp.bfloat16)
    assert out2.shape == (10, action_size)
    assert jnp.allclose(out2, ref2, atol=1e-4, rtol=1e-4), "ragged-batch mismatch"

    print("KERNEL_OK")
</pallas_src>

<mosaic_0001>
module attributes {stable_mosaic.version = 11 : i64} {
  func.func @_qnetwork_kernel(%arg0: i32, %arg1: memref<8x8xf32, #tpu.memory_space<vmem>>, %arg2: memref<8x128xbf16, #tpu.memory_space<vmem>>, %arg3: memref<4x128x128xbf16, #tpu.memory_space<vmem>>, %arg4: memref<8x128xf32, #tpu.memory_space<vmem>>, %arg5: memref<8x128xf32, #tpu.memory_space<vmem>>) attributes {dimension_semantics = [#tpu.dimension_semantics<parallel>], iteration_bounds = array<i64: 1>, scalar_prefetch = 0 : i64, scratch_operands = 0 : i64, tpu.core_type = #tpu.core_type<tc>, window_params = [{transform_indices = @transform_0, window_bounds = array<i64: 8, 8>}, {pipeline_mode = #tpu.pipeline_mode<synchronous>, transform_indices = @transform_1, window_bounds = array<i64: 8, 128>}, {pipeline_mode = #tpu.pipeline_mode<synchronous>, transform_indices = @transform_2, window_bounds = array<i64: 4, 128, 128>}, {pipeline_mode = #tpu.pipeline_mode<synchronous>, transform_indices = @transform_3, window_bounds = array<i64: 8, 128>}, {transform_indices = @transform_4, window_bounds = array<i64: 8, 128>}]} {
    %c0 = arith.constant 0 : index
    %c0_0 = arith.constant 0 : index
    %0 = vector.load %arg1[%c0, %c0_0] : memref<8x8xf32, #tpu.memory_space<vmem>>, vector<8x8xf32>
    %c0_1 = arith.constant 0 : index
    %c0_2 = arith.constant 0 : index
    %1 = vector.load %arg4[%c0_1, %c0_2] : memref<8x128xf32, #tpu.memory_space<vmem>>, vector<8x128xf32>
    %c0_3 = arith.constant 0 : index
    %c0_4 = arith.constant 0 : index
    %2 = vector.load %arg2[%c0_3, %c0_4] : memref<8x128xbf16, #tpu.memory_space<vmem>>, vector<8x128xbf16>
    %3 = arith.truncf %0 : vector<8x8xf32> to vector<8x8xbf16>
    %cst = arith.constant dense<0.000000e+00> : vector<8x128xf32>
    %4 = tpu.matmul %3, %2, %cst {dimension_numbers = #tpu.dot_dimension_numbers<[1], [0], [0], [1], [0, 0, 1, 1], [], []>} : vector<8x8xbf16>, vector<8x128xbf16>, vector<8x128xf32> -> vector<8x128xf32>
    %5 = vector.extract_strided_slice %1 {offsets = [0, 0], sizes = [1, 128], strides = [1, 1]} : vector<8x128xf32> to vector<1x128xf32>
    %6 = vector.broadcast %5 : vector<1x128xf32> to vector<8x128xf32>
    %7 = arith.addf %4, %6 : vector<8x128xf32>
    %cst_5 = arith.constant 0.000000e+00 : f32
    %8 = vector.broadcast %cst_5 : f32 to vector<8x128xf32>
    %9 = arith.maximumf %7, %8 : vector<8x128xf32>
    %c0_6 = arith.constant 0 : index
    %c0_7 = arith.constant 0 : index
    %c0_8 = arith.constant 0 : index
    %10 = vector.load %arg3[%c0_6, %c0_7, %c0_8] : memref<4x128x128xbf16, #tpu.memory_space<vmem>>, vector<1x128x128xbf16>
    %11 = vector.shape_cast %10 : vector<1x128x128xbf16> to vector<128x128xbf16>
    %12 = arith.truncf %9 : vector<8x128xf32> to vector<8x128xbf16>
    %cst_9 = arith.constant dense<0.000000e+00> : vector<8x128xf32>
    %13 = tpu.matmul %12, %11, %cst_9 {dimension_numbers = #tpu.dot_dimension_numbers<[1], [0], [0], [1], [0, 0, 1, 1], [], []>} : vector<8x128xbf16>, vector<128x128xbf16>, vector<8x128xf32> -> vector<8x128xf32>
    %14 = vector.extract_strided_slice %1 {offsets = [1, 0], sizes = [1, 128], strides = [1, 1]} : vector<8x128xf32> to vector<1x128xf32>
    %15 = vector.broadcast %14 : vector<1x128xf32> to vector<8x128xf32>
    %16 = arith.addf %13, %15 : vector<8x128xf32>
    %cst_10 = arith.constant 0.000000e+00 : f32
    %17 = vector.broadcast %cst_10 : f32 to vector<8x128xf32>
    %18 = arith.maximumf %16, %17 : vector<8x128xf32>
    %c1 = arith.constant 1 : index
    %c0_11 = arith.constant 0 : index
    %c0_12 = arith.constant 0 : index
    %19 = vector.load %arg3[%c1, %c0_11, %c0_12] : memref<4x128x128xbf16, #tpu.memory_space<vmem>>, vector<1x128x128xbf16>
    %20 = vector.shape_cast %19 : vector<1x128x128xbf16> to vector<128x128xbf16>
    %21 = arith.truncf %18 : vector<8x128xf32> to vector<8x128xbf16>
    %cst_13 = arith.constant dense<0.000000e+00> : vector<8x128xf32>
    %22 = tpu.matmul %21, %20, %cst_13 {dimension_numbers = #tpu.dot_dimension_numbers<[1], [0], [0], [1], [0, 0, 1, 1], [], []>} : vector<8x128xbf16>, vector<128x128xbf16>, vector<8x128xf32> -> vector<8x128xf32>
    %23 = vector.extract_strided_slice %1 {offsets = [2, 0], sizes = [1, 128], strides = [1, 1]} : vector<8x128xf32> to vector<1x128xf32>
    %24 = vector.broadcast %23 : vector<1x128xf32> to vector<8x128xf32>
    %25 = arith.addf %22, %24 : vector<8x128xf32>
    %cst_14 = arith.constant 0.000000e+00 : f32
    %26 = vector.broadcast %cst_14 : f32 to vector<8x128xf32>
    %27 = arith.maximumf %25, %26 : vector<8x128xf32>
    %c2 = arith.constant 2 : index
    %c0_15 = arith.constant 0 : index
    %c0_16 = arith.constant 0 : index
    %28 = vector.load %arg3[%c2, %c0_15, %c0_16] : memref<4x128x128xbf16, #tpu.memory_space<vmem>>, vector<1x128x128xbf16>
    %29 = vector.shape_cast %28 : vector<1x128x128xbf16> to vector<128x128xbf16>
    %30 = arith.truncf %27 : vector<8x128xf32> to vector<8x128xbf16>
    %cst_17 = arith.constant dense<0.000000e+00> : vector<8x128xf32>
    %31 = tpu.matmul %30, %29, %cst_17 {dimension_numbers = #tpu.dot_dimension_numbers<[1], [0], [0], [1], [0, 0, 1, 1], [], []>} : vector<8x128xbf16>, vector<128x128xbf16>, vector<8x128xf32> -> vector<8x128xf32>
    %32 = vector.extract_strided_slice %1 {offsets = [3, 0], sizes = [1, 128], strides = [1, 1]} : vector<8x128xf32> to vector<1x128xf32>
    %33 = vector.broadcast %32 : vector<1x128xf32> to vector<8x128xf32>
    %34 = arith.addf %31, %33 : vector<8x128xf32>
    %cst_18 = arith.constant 0.000000e+00 : f32
    %35 = vector.broadcast %cst_18 : f32 to vector<8x128xf32>
    %36 = arith.maximumf %34, %35 : vector<8x128xf32>
    %c3 = arith.constant 3 : index
    %c0_19 = arith.constant 0 : index
    %c0_20 = arith.constant 0 : index
    %37 = vector.load %arg3[%c3, %c0_19, %c0_20] : memref<4x128x128xbf16, #tpu.memory_space<vmem>>, vector<1x128x128xbf16>
    %38 = vector.shape_cast %37 : vector<1x128x128xbf16> to vector<128x128xbf16>
    %39 = arith.truncf %36 : vector<8x128xf32> to vector<8x128xbf16>
    %cst_21 = arith.constant dense<0.000000e+00> : vector<8x128xf32>
    %40 = tpu.matmul %39, %38, %cst_21 {dimension_numbers = #tpu.dot_dimension_numbers<[1], [0], [0], [1], [0, 0, 1, 1], [], []>} : vector<8x128xbf16>, vector<128x128xbf16>, vector<8x128xf32> -> vector<8x128xf32>
    %41 = vector.extract_strided_slice %1 {offsets = [4, 0], sizes = [1, 128], strides = [1, 1]} : vector<8x128xf32> to vector<1x128xf32>
    %42 = vector.broadcast %41 : vector<1x128xf32> to vector<8x128xf32>
    %43 = arith.addf %40, %42 : vector<8x128xf32>
    %44 = vector.extract_strided_slice %1 {offsets = [5, 0], sizes = [1, 128], strides = [1, 1]} : vector<8x128xf32> to vector<1x128xf32>
    %45 = vector.broadcast %44 : vector<1x128xf32> to vector<8x128xf32>
    %46 = arith.mulf %43, %45 : vector<8x128xf32>
    %cst_22 = arith.constant dense<0.000000e+00> : vector<8xf32>
    %47 = vector.multi_reduction <add>, %46, %cst_22 [1] : vector<8x128xf32> to vector<8xf32>
    %48 = vector.shape_cast %47 : vector<8xf32> to vector<8x1xf32>
    %49 = vector.extract_strided_slice %1 {offsets = [6, 0], sizes = [1, 128], strides = [1, 1]} : vector<8x128xf32> to vector<1x128xf32>
    %50 = vector.broadcast %49 : vector<1x128xf32> to vector<8x128xf32>
    %51 = arith.mulf %43, %50 : vector<8x128xf32>
    %cst_23 = arith.constant dense<0.000000e+00> : vector<8xf32>
    %52 = vector.multi_reduction <add>, %51, %cst_23 [1] : vector<8x128xf32> to vector<8xf32>
    %53 = vector.shape_cast %52 : vector<8xf32> to vector<8x1xf32>
    %54 = arith.subf %53, %48 : vector<8x1xf32>
    %55 = vector.broadcast %54 : vector<8x1xf32> to vector<8x128xf32>
    %56 = arith.addf %55, %43 : vector<8x128xf32>
    %c0_24 = arith.constant 0 : index
    %c0_25 = arith.constant 0 : index
    %57 = vector.load %arg5[%c0_24, %c0_25] : memref<8x128xf32, #tpu.memory_space<vmem>>, vector<8x128xf32>
    tpu.vector_store %arg5[%c0_24, %c0_25], %56 {strides = array<i32>} : memref<8x128xf32, #tpu.memory_space<vmem>>, vector<8x128xf32>,
    return
  }
  func.func @transform_0(%arg0: i32) -> (i32, i32) {
    %c0_i32 = arith.constant 0 : i32
    %c0_i32_0 = arith.constant 0 : i32
    return %arg0, %c0_i32 : i32, i32
  }
  func.func @transform_1(%arg0: i32) -> (i32, i32) {
    %c0_i32 = arith.constant 0 : i32
    %c0_i32_0 = arith.constant 0 : i32
    %c0_i32_1 = arith.constant 0 : i32
    return %c0_i32, %c0_i32_0 : i32, i32
  }
  func.func @transform_2(%arg0: i32) -> (i32, i32, i32) {
    %c0_i32 = arith.constant 0 : i32
    %c0_i32_0 = arith.constant 0 : i32
    %c0_i32_1 = arith.constant 0 : i32
    %c0_i32_2 = arith.constant 0 : i32
    return %c0_i32, %c0_i32_0, %c0_i32_1 : i32, i32, i32
  }
  func.func @transform_3(%arg0: i32) -> (i32, i32) {
    %c0_i32 = arith.constant 0 : i32
    %c0_i32_0 = arith.constant 0 : i32
    %c0_i32_1 = arith.constant 0 : i32
    return %c0_i32, %c0_i32_0 : i32, i32
  }
  func.func @transform_4(%arg0: i32) -> (i32, i32) {
    %c0_i32 = arith.constant 0 : i32
    %c0_i32_0 = arith.constant 0 : i32
    return %arg0, %c0_i32 : i32, i32
  }
}

</mosaic_0001>

<bundles_post_ra>
// kernel: tpu_custom_call.1
= control target key start
LH: loop header
LB: loop body
LE: loop exit
PB: predicated region body
PF: predicated region fallthrough
CT: control target
= control target key end

     0   :  { %9 = vsyncpa [#allocation3], 0  ;;  %s1017_s0 = inlined_call_operand.hbm [shape: f32[8,8], index: 0, kind: input, shape index: {}]   ;;  %s1018_s1 = inlined_call_operand.hbm [shape: bf16[8,128], index: 1, kind: input, shape index: {}]   ;;  %s1019_s2 = inlined_call_operand.hbm [shape: bf16[4,128,128], index: 2, kind: input, shape index: {}]   ;;  %s1020_s3 = inlined_call_operand.hbm [shape: f32[8,128], index: 3, kind: input, shape index: {}]   ;;  %s1021_s4 = inlined_call_operand.hbm [shape: f32[8,128], index: 4, kind: output, shape index: {}]  }
   0x1   :  { %10 = vsyncpa [#allocation6], 0 }
   0x2   :  { %11 = vsyncpa [#allocation9], 0 }
   0x3   :  { %12 = vsyncpa [#allocation4], 0  ;;  %s907_s15 = smov [#allocation5]   ;;  %s908_s17 = smov [#allocation2]  }
   0x4   :  { %s29_s16 = sshll.u32 %s907_s15, 4  ;;  %s19_s18 = sshll.u32 %s908_s17, 4  ;;  %s30_s16 = int_to_ptr.vmem [resolvable:$true] %s29_s16  ;;  %s20_s18 = int_to_ptr.vmem [resolvable:$true] %s19_s18 }
   0x5   :  { %s807_s19 = scalar_lea.vmem %s30_s16, 64  ;;  %p812_p1 = scmp.lt.s32.totalorder %s30_s16, %s30_s16 }
   0x6   :  { %p808_p0 = scmp.ne.s32.totalorder %s30_s16, %s807_s19  ;;  %p813_p2 = scmp.lt.s32.totalorder %s807_s19, %s807_s19 }
   0x8   :  { %p814_p3 = por %p813_p2, %p812_p1 }
   0xa   :  { %p815_p4 = pnand %p814_p3, %p808_p0 }
   0xc   :  { %818 = shalt.err (!%p815_p4)
}
   0xd   :  { %32 = dma.hbm_to_vmem [thread:$0]  %s1018_s1, 64, %s30_s16, [#allocation6]  }
   0xe   :  { %s827_s22 = scalar_lea.vmem %s20_s18, 128  ;;  %p832_p6 = scmp.lt.s32.totalorder %s20_s18, %s20_s18 }
   0xf   :  { %p828_p5 = scmp.ne.s32.totalorder %s20_s18, %s827_s22  ;;  %p833_p7 = scmp.lt.s32.totalorder %s827_s22, %s827_s22 }
  0x11   :  { %p834_p8 = por %p833_p7, %p832_p6 }
  0x13   :  { %p835_p9 = pnand %p834_p8, %p828_p5 }
  0x15   :  { %838 = shalt.err (!%p835_p9)
}
  0x16   :  { %22 = dma.hbm_to_vmem [thread:$0]  %s1017_s0, 128, %s20_s18, [#allocation3]  }
  0x17   :  { %s909_s25 = smov [#allocation7]  }
  0x18   :  { %s38_s26 = sshll.u32 %s909_s25, 4  ;;  %s39_s26 = int_to_ptr.vmem [resolvable:$true] %s38_s26 }
  0x19   :  { %s847_s27 = scalar_lea.vmem %s39_s26, 4096  ;;  %p852_p11 = scmp.lt.s32.totalorder %s39_s26, %s39_s26 }
  0x1a   :  { %p848_p10 = scmp.ne.s32.totalorder %s39_s26, %s847_s27  ;;  %p853_p12 = scmp.lt.s32.totalorder %s847_s27, %s847_s27 }
  0x1c   :  { %p854_p13 = por %p853_p12, %p852_p11 }
  0x1e   :  { %p855_p0 = pnand %p854_p13, %p848_p10 }
  0x20   :  { %858 = shalt.err (!%p855_p0)
}
  0x21   :  { %s910_s1 = smov 64   ;;  %s911_s28 = smov 4  }
  0x22   :  { %44 = dma.hbm_to_vmem [thread:$0]  %s1019_s2, 4096, %s39_s26, [#allocation6], %s910_s1, %s910_s1, %s911_s28  }
  0x23   :  { %s912_s5 = smov [#allocation8]  }
  0x24   :  { %s51_s6 = sshll.u32 %s912_s5, 4  ;;  %s52_s6 = int_to_ptr.vmem [resolvable:$true] %s51_s6 }
  0x25   :  { %s867_s0 = scalar_lea.vmem %s52_s6, 128  ;;  %p872_p2 = scmp.lt.s32.totalorder %s52_s6, %s52_s6 }
  0x26   :  { %p868_p1 = scmp.ne.s32.totalorder %s52_s6, %s867_s0  ;;  %p873_p3 = scmp.lt.s32.totalorder %s867_s0, %s867_s0 }
  0x28   :  { %p874_p4 = por %p873_p3, %p872_p2 }
  0x2a   :  { %p875_p5 = pnand %p874_p4, %p868_p1 }
  0x2c   :  { %878 = shalt.err (!%p875_p5)
}
  0x2d   :  { %54 = dma.hbm_to_vmem [thread:$0]  %s1020_s3, 128, %s52_s6, [#allocation9]  }
  0x2e   :  { %899 = dma.done.wait [#allocation3], 128  }
  0x2f   :  { %900 = vsyncadd [#allocation3], 4294967168 }
  0x30   :  { %901 = dma.done.wait [#allocation6], 4160  }
  0x31   :  { %902 = vsyncadd [#allocation6], 4294963136 }
  0x32   :  { %903 = dma.done.wait [#allocation9], 128  }
  0x33   :  { %904 = vsyncadd [#allocation9], 4294967168  ;;  %v913_v0 = vmov 0.0   ;;  %vm914_vm0 = vmmov 0   ;;  %vm80_vm1 = vcmask 1043456   ;;  %v68_v2 = vld [vmem:[#allocation2] sm:$0xff]  ;;  %v72_v19 = vlaneseq }
  0x34   :  { %672 = vmatprep.subr.bf16.mxu0 %v913_v0  ;;  %674 = vmatprep.mubr.msk.bf16.mxu0 %vm914_vm0, %v913_v0  ;;  %v70_v1 = vld [vmem:[#allocation5] sm:$0xf]  ;;  %v71_v4 = vpack.c.bf16 %v68_v2, %v68_v2  ;;  %vm76_vm2 = vcmask 64512   ;;  %v768_v6 = vld [vmem:[#allocation7 + $0x30] sm:$0xff]   ;;  %v769_v7 = vld [vmem:[#allocation7 + $0x28] sm:$0xff]   ;;  %s915_s2 = smov [#allocation10]  }
  0x35   :  { %678 = vmatprep.subr.bf16.mxu1 %v913_v0  ;;  %694 = vmatprep.mubr.msk.bf16.mxu1 %vm914_vm0, %v913_v0  ;;  %v82_v3 = vsel %vm80_vm1, %v70_v1, 0  ;;  %v767_v5 = vld [vmem:[#allocation7 + $0x38] sm:$0xff]   ;;  %v770_v8 = vld [vmem:[#allocation7 + $0x20] sm:$0xff]   ;;  %v772_v10 = vld [vmem:[#allocation7 + $0x10] sm:$0xff]   ;;  %v976_v20 = vshrl.u32 %v72_v19, 7  ;;  %s590_s3 = sshll.u32 %s915_s2, 4  ;;  %s591_s3 = int_to_ptr.vmem [resolvable:$true] %s590_s3 }
  0x36   :  { %673 = vmatpush3.bf16.msra.mxu0 %v82_v3  ;;  %679 = vmatpush3.bf16.msra.mxu1 %v767_v5  ;;  %v771_v9 = vld [vmem:[#allocation7 + $0x18] sm:$0xff]   ;;  %v773_v11 = vld [vmem:[#allocation7 + $0x8] sm:$0xff]   ;;  %v774_v12 = vld [vmem:[#allocation7] sm:$0xff]   ;;  %s879_s9 = scalar_lea.vmem %s591_s3, 128  ;;  %p884_p7 = scmp.lt.s32.totalorder %s591_s3, %s591_s3 }
  0x37   :  { %698 = vmatprep.subr.bf16.mxu0 %v913_v0  ;;  %680 = vmatprep.subr.bf16.mxu1 %v913_v0  ;;  %v775_v13 = vld [vmem:[#allocation7 + $0x78] sm:$0xff]   ;;  %v776_v14 = vld [vmem:[#allocation7 + $0x70] sm:$0xff]   ;;  %v777_v15 = vld [vmem:[#allocation7 + $0x68] sm:$0xff]   ;;  %v74_v21 = vsub.s32 0, %v976_v20  ;;  %v144_v39 = vsub.s32 1, %v976_v20  ;;  %v255_v56 = vsub.s32 2, %v976_v20  ;;  %p880_p6 = scmp.ne.s32.totalorder %s591_s3, %s879_s9  ;;  %p885_p8 = scmp.lt.s32.totalorder %s879_s9, %s879_s9 }
  0x38   :  { %v778_v16 = vld [vmem:[#allocation7 + $0x60] sm:$0xff]   ;;  %v779_v17 = vld [vmem:[#allocation7 + $0x58] sm:$0xff]   ;;  %v780_v18 = vld [vmem:[#allocation7 + $0x50] sm:$0xff]  }
  0x39   :  { %675 = vmatmul.mubr.msk.bf16.vlgmr.msra.gmra.mxu0 %vm76_vm2, %v71_v4  ;;  %v979_v22 = vld [vmem:[#allocation8] sm:$0xff]  ;;  %v781_v31 = vld [vmem:[#allocation7 + $0x48] sm:$0xff]   ;;  %v783_v33 = vld [vmem:[#allocation7 + $0xb8] sm:$0xff]   ;;  %v366_v4 = vsub.s32 3, %v976_v20  ;;  %p886_p9 = por %p885_p8, %p884_p7 }
  0x3a   :  { %714 = vmatprep.mubr.msk.bf16.mxu0 %vm914_vm0, %v913_v0  ;;  %681 = vmatpush3.bf16.msra.mxu1 %v768_v6  ;;  %v75_v23 = vrot.slane %v979_v22, %v74_v21  ;;  %v782_v32 = vld [vmem:[#allocation7 + $0x40] sm:$0xff]   ;;  %v784_v34 = vld [vmem:[#allocation7 + $0xb0] sm:$0xff]   ;;  %v785_v35 = vld [vmem:[#allocation7 + $0xa8] sm:$0xff]   ;;  %v145_v40 = vrot.slane %v979_v22, %v144_v39  ;;  %v256_v57 = vrot.slane %v979_v22, %v255_v56 }
  0x3b   :  { %682 = vmatprep.subr.bf16.mxu1 %v913_v0  ;;  %699 = vmatpush3.bf16.msra.mxu0 %v775_v13  ;;  %v786_v36 = vld [vmem:[#allocation7 + $0xa0] sm:$0xff]   ;;  %v787_v37 = vld [vmem:[#allocation7 + $0x98] sm:$0xff]   ;;  %v788_v38 = vld [vmem:[#allocation7 + $0x90] sm:$0xff]   ;;  %v367_v5 = vrot.slane %v979_v22, %v366_v4  ;;  %v477_v13 = vsub.s32 4, %v976_v20  ;;  %p887_p10 = pnand %p886_p9, %p880_p6 }
  0x3c   :  { %700 = vmatprep.subr.bf16.mxu0 %v913_v0  ;;  %v789_v48 = vld [vmem:[#allocation7 + $0x88] sm:$0xff]   ;;  %v790_v49 = vld [vmem:[#allocation7 + $0x80] sm:$0xff]   ;;  %v791_v50 = vld [vmem:[#allocation7 + $0xf8] sm:$0xff]  }
  0x3d   :  { %v792_v51 = vld [vmem:[#allocation7 + $0xf0] sm:$0xff]   ;;  %v793_v52 = vld [vmem:[#allocation7 + $0xe8] sm:$0xff]   ;;  %v794_v53 = vld [vmem:[#allocation7 + $0xe0] sm:$0xff]  }
  0x3e   :  { %683 = vmatpush3.bf16.msra.mxu1 %v769_v7  ;;  %v795_v54 = vld [vmem:[#allocation7 + $0xd8] sm:$0xff]   ;;  %v796_v55 = vld [vmem:[#allocation7 + $0xd0] sm:$0xff]   ;;  %v797_v2 = vld [vmem:[#allocation7 + $0xc8] sm:$0xff]  }
  0x3f   :  { %684 = vmatprep.subr.bf16.mxu1 %v913_v0  ;;  %701 = vmatpush3.bf16.msra.mxu0 %v776_v14  ;;  %v798_v3 = vld [vmem:[#allocation7 + $0xc0] sm:$0xff]   ;;  %v569_v14 = vsub.s32 5, %v976_v20 }
  0x40   :  { %702 = vmatprep.subr.bf16.mxu0 %v913_v0 }
  0x42   :  { %685 = vmatpush3.bf16.msra.mxu1 %v770_v8 }
  0x43   :  { %686 = vmatprep.subr.bf16.mxu1 %v913_v0  ;;  %703 = vmatpush3.bf16.msra.mxu0 %v777_v15  ;;  %v570_v15 = vrot.slane %v979_v22, %v569_v14 }
  0x44   :  { %704 = vmatprep.subr.bf16.mxu0 %v913_v0 }
  0x46   :  { %687 = vmatpush3.bf16.msra.mxu1 %v771_v9 }
  0x47   :  { %688 = vmatprep.subr.bf16.mxu1 %v913_v0  ;;  %705 = vmatpush3.bf16.msra.mxu0 %v778_v16  ;;  %v576_v16 = vsub.s32 6, %v976_v20 }
  0x48   :  { %706 = vmatprep.subr.bf16.mxu0 %v913_v0 }
  0x4a   :  { %689 = vmatpush3.bf16.msra.mxu1 %v772_v10 }
  0x4b   :  { %690 = vmatprep.subr.bf16.mxu1 %v913_v0  ;;  %707 = vmatpush3.bf16.msra.mxu0 %v779_v17 }
  0x4c   :  { %708 = vmatprep.subr.bf16.mxu0 %v913_v0 }
  0x4e   :  { %691 = vmatpush3.bf16.msra.mxu1 %v773_v11 }
  0x4f   :  { %692 = vmatprep.subr.bf16.mxu1 %v913_v0  ;;  %709 = vmatpush3.bf16.msra.mxu0 %v780_v18 }
  0x50   :  { %710 = vmatprep.subr.bf16.mxu0 %v913_v0 }
  0x52   :  { %693 = vmatpush3.bf16.msra.mxu1 %v774_v12 }
  0x53   :  { %718 = vmatprep.subr.bf16.mxu1 %v913_v0  ;;  %711 = vmatpush3.bf16.msra.mxu0 %v781_v31 }
  0x54   :  { %712 = vmatprep.subr.bf16.mxu0 %v913_v0 }
  0x57   :  { %713 = vmatpush3.bf16.msra.mxu0 %v782_v32 }
  0x58   :  { %738 = vmatprep.subr.bf16.mxu0 %v913_v0 }
  0xf9   :  { %v118_v24 = vpop.f32.mrf.mxu0 }
  0xfa   :  { %v119_v25 = vadd.f32 %v118_v24, %v75_v23  ;;  %v577_v23 = vrot.slane %v979_v22, %v576_v16 }
  0xfb   :  { %v676_v26 = vpop.f32.mrf.mxu0 }
  0xfc   :  { %v124_v27 = vmax.f32 %v119_v25, 0.0 }
  0xfd   :  { %v121_v28 = vpop.f32.mrf.mxu0 }
  0xfe   :  { %v141_v29 = vpack.c.bf16 %v124_v27, %v124_v27 }
  0xff   :  { %v677_v30 = vpop.f32.mrf.mxu0 }
 0x100   :  { %695 = vmatmul.mubr.bf16.vlgmr.msra.gmra.mxu1 %v141_v29 }
 0x101   :  { %734 = vmatprep.mubr.msk.bf16.mxu1 %vm914_vm0, %v913_v0  ;;  %719 = vmatpush3.bf16.msra.mxu1 %v783_v33 }
 0x102   :  { %720 = vmatprep.subr.bf16.mxu1 %v913_v0 }
 0x105   :  { %721 = vmatpush3.bf16.msra.mxu1 %v784_v34 }
 0x106   :  { %722 = vmatprep.subr.bf16.mxu1 %v913_v0 }
 0x109   :  { %723 = vmatpush3.bf16.msra.mxu1 %v785_v35 }
 0x10a   :  { %724 = vmatprep.subr.bf16.mxu1 %v913_v0 }
 0x10d   :  { %725 = vmatpush3.bf16.msra.mxu1 %v786_v36 }
 0x10e   :  { %726 = vmatprep.subr.bf16.mxu1 %v913_v0 }
 0x111   :  { %727 = vmatpush3.bf16.msra.mxu1 %v787_v37 }
 0x112   :  { %728 = vmatprep.subr.bf16.mxu1 %v913_v0 }
 0x115   :  { %729 = vmatpush3.bf16.msra.mxu1 %v788_v38 }
 0x116   :  { %730 = vmatprep.subr.bf16.mxu1 %v913_v0 }
 0x119   :  { %731 = vmatpush3.bf16.msra.mxu1 %v789_v48 }
 0x11a   :  { %732 = vmatprep.subr.bf16.mxu1 %v913_v0 }
 0x11d   :  { %733 = vmatpush3.bf16.msra.mxu1 %v790_v49 }
 0x1c0   :  { %v228_v41 = vpop.f32.mrf.mxu1 }
 0x1c1   :  { %v229_v42 = vadd.f32 %v228_v41, %v145_v40 }
 0x1c2   :  { %v696_v43 = vpop.f32.mrf.mxu1 }
 0x1c3   :  { %v234_v44 = vmax.f32 %v229_v42, 0.0 }
 0x1c4   :  { %v231_v45 = vpop.f32.mrf.mxu1 }
 0x1c5   :  { %v252_v46 = vpack.c.bf16 %v234_v44, %v234_v44 }
 0x1c6   :  { %v697_v47 = vpop.f32.mrf.mxu1 }
 0x1c7   :  { %715 = vmatmul.mubr.bf16.vlgmr.msra.gmra.mxu0 %v252_v46 }
 0x1c8   :  { %754 = vmatprep.mubr.msk.bf16.mxu0 %vm914_vm0, %v913_v0  ;;  %739 = vmatpush3.bf16.msra.mxu0 %v791_v50 }
 0x1c9   :  { %740 = vmatprep.subr.bf16.mxu0 %v913_v0 }
 0x1cc   :  { %741 = vmatpush3.bf16.msra.mxu0 %v792_v51 }
 0x1cd   :  { %742 = vmatprep.subr.bf16.mxu0 %v913_v0 }
 0x1d0   :  { %743 = vmatpush3.bf16.msra.mxu0 %v793_v52 }
 0x1d1   :  { %744 = vmatprep.subr.bf16.mxu0 %v913_v0 }
 0x1d4   :  { %745 = vmatpush3.bf16.msra.mxu0 %v794_v53 }
 0x1d5   :  { %746 = vmatprep.subr.bf16.mxu0 %v913_v0 }
 0x1d8   :  { %747 = vmatpush3.bf16.msra.mxu0 %v795_v54 }
 0x1d9   :  { %748 = vmatprep.subr.bf16.mxu0 %v913_v0 }
 0x1dc   :  { %749 = vmatpush3.bf16.msra.mxu0 %v796_v55 }
 0x1dd   :  { %750 = vmatprep.subr.bf16.mxu0 %v913_v0 }
 0x1e0   :  { %751 = vmatpush3.bf16.msra.mxu0 %v797_v2 }
 0x1e1   :  { %752 = vmatprep.subr.bf16.mxu0 %v913_v0  ;;  %v478_v0 = vrot.slane %v979_v22, %v477_v13 }
 0x1e4   :  { %753 = vmatpush3.bf16.msra.mxu0 %v798_v3 }
 0x287   :  { %v339_v58 = vpop.f32.mrf.mxu0 }
 0x288   :  { %v340_v59 = vadd.f32 %v339_v58, %v256_v57 }
 0x289   :  { %v716_v60 = vpop.f32.mrf.mxu0 }
 0x28a   :  { %v345_v61 = vmax.f32 %v340_v59, 0.0 }
 0x28b   :  { %v342_v62 = vpop.f32.mrf.mxu0 }
 0x28c   :  { %v363_v63 = vpack.c.bf16 %v345_v61, %v345_v61 }
 0x28d   :  { %v717_v1 = vpop.f32.mrf.mxu0 }
 0x28e   :  { %735 = vmatmul.mubr.bf16.vlgmr.msra.gmra.mxu1 %v363_v63 }
 0x34e   :  { %v450_v6 = vpop.f32.mrf.mxu1 }
 0x34f   :  { %v451_v7 = vadd.f32 %v450_v6, %v367_v5 }
 0x350   :  { %v736_v8 = vpop.f32.mrf.mxu1 }
 0x351   :  { %v456_v9 = vmax.f32 %v451_v7, 0.0 }
 0x352   :  { %v453_v10 = vpop.f32.mrf.mxu1 }
 0x353   :  { %v474_v11 = vpack.c.bf16 %v456_v9, %v456_v9 }
 0x354   :  { %v737_v12 = vpop.f32.mrf.mxu1 }
 0x355   :  { %755 = vmatmul.mubr.bf16.vlgmr.msra.gmra.mxu0 %v474_v11 }
 0x415   :  { %v561_v17 = vpop.f32.mrf.mxu0 }
 0x416   :  { %v562_v18 = vadd.f32 %v561_v17, %v478_v0 }
 0x417   :  { %v756_v19 = vpop.f32.mrf.mxu0 }
 0x418   :  { %v571_v21 = vmul.f32 %v570_v15, %v562_v18  ;;  %v578_v26 = vmul.f32 %v577_v23, %v562_v18 }
 0x419   :  { %v564_v24 = vpop.f32.mrf.mxu0 }
 0x41a   :  { %572 = vadd.xlane.f32.xlu0 %v571_v21 }
 0x41b   :  { %v757_v25 = vpop.f32.mrf.mxu0 }
 0x41e   :  { %579 = vadd.xlane.f32.xlu0 %v578_v26 }
 0x4a3   :  { %v573_v27 = vpop.xlane.xlu0 %572 }
 0x4a7   :  { %v580_v28 = vpop.xlane.xlu0 %579 }
 0x4a8   :  { %v581_v29 = vsub.f32 %v580_v28, %v573_v27 }
 0x4aa   :  { %v582_v30 = vadd.f32 %v581_v29, %v562_v18 }
 0x4ac   :  { %583 = vst [vmem:[#allocation10] sm:$0xff] %v582_v30 }
 0x4ad   :  { %890 = shalt.err (!%p887_p10)
}
 0x4ae   :  { %593 = dma.vmem_to_hbm [thread:$0]  %s591_s3, 128, %s1021_s4, [#allocation4]  }
 0x4af   :  { %905 = dma.done.wait [#allocation4], 128  }
 0x4b0   :  { %906 = vsyncadd [#allocation4], 4294967168 }
 0x4b1   :  { %597 = vsyncpa [#allocation3], 1 }
 0x4b2   :  { %598 = vsyncpa [#allocation6], 1 }
 0x4b3   :  { %599 = vsyncpa [#allocation9], 1 }
 0x4b4   :  { %600 = vsyncpa [#allocation4], 1 }

</bundles_post_ra>
